<compile_context>
chip_gen: v7x
topology: tpu7x:2x2x1
jax: 0.10.0
libtpu: 0.0.40
codegen_flags: <defaults>
</compile_context>

<pallas_src>
import functools
import math

import jax
import jax.numpy as jnp
from jax.experimental import pallas as pl
from jax.experimental.pallas import tpu as pltpu


# ---------------------------------------------------------------------------
# Tiling / compiler-param helpers
# ---------------------------------------------------------------------------

def _pick_tile(dim, cap, quantum):
    """Largest tile <= cap that divides `dim` and is a multiple of `quantum`;
    falls back to the full dim (always legal as a BlockSpec block)."""
    if dim <= cap:
        return dim
    t = (cap // quantum) * quantum
    while t >= quantum:
        if dim % t == 0:
            return t
        t -= quantum
    return dim


def _row_tile(M, cap=256):
    """Row tile for the row-tiled fused kernels; keeps >=4 grid steps when
    possible so v7x's two TensorCores both get work."""
    tm = _pick_tile(M, cap, 8)
    while M // tm < 4 and tm >= 16 and tm % 16 == 0:
        tm //= 2
    return tm


def _cparams(sems, nbytes):
    """CompilerParams with an explicit VMEM limit sized from the rough buffer
    byte count (2x headroom), clipped to [16 MiB, 64 MiB] (v7x physical)."""
    lim = int(min(64 * 1024 * 1024,
                  max(16 * 1024 * 1024, 2 * int(nbytes) + (4 << 20))))
    return pltpu.CompilerParams(dimension_semantics=sems, vmem_limit_bytes=lim)


_BUFFERED1_OK = None


def _buffered1_supported():
    """Probe (once) whether BlockSpec(pipeline_mode=pl.Buffered(1)) works on
    this JAX/libtpu.  Used only for grid-invariant operands; falls back to the
    default double-buffered spec if unsupported."""
    global _BUFFERED1_OK
    if _BUFFERED1_OK is None:
        try:
            def _probe(a_ref, b_ref, o_ref):
                o_ref[...] = a_ref[...] + b_ref[...]

            r = pl.pallas_call(
                _probe,
                out_shape=jax.ShapeDtypeStruct((16, 128), jnp.float32),
                grid=(2,),
                in_specs=[pl.BlockSpec((8, 128), lambda i: (i, 0)),
                          pl.BlockSpec((8, 128), lambda i: (0, 0),
                                       pipeline_mode=pl.Buffered(1))],
                out_specs=pl.BlockSpec((8, 128), lambda i: (i, 0)),
            )(jnp.zeros((16, 128), jnp.float32), jnp.zeros((8, 128), jnp.float32))
            jax.block_until_ready(r)
            _BUFFERED1_OK = bool(jnp.all(r == 0.0))
        except Exception:
            _BUFFERED1_OK = False
    return _BUFFERED1_OK


def _const_spec(block_shape, index_map):
    """BlockSpec for a grid-invariant operand (constant index map)."""
    if _buffered1_supported():
        return pl.BlockSpec(block_shape, index_map, pipeline_mode=pl.Buffered(1))
    return pl.BlockSpec(block_shape, index_map)


# ---------------------------------------------------------------------------
# Tiled linear (bf16 in, f32 accumulate, bias fused into the writeback)
# ---------------------------------------------------------------------------

def _linear_kernel(x_ref, w_ref, b_ref, o_ref, acc_ref):
    @pl.when(pl.program_id(2) == 0)
    def _():
        acc_ref[...] = jnp.zeros_like(acc_ref)

    acc_ref[...] += jnp.dot(x_ref[...], w_ref[...],
                            preferred_element_type=jnp.float32)

    @pl.when(pl.program_id(2) == pl.num_programs(2) - 1)
    def _():
        o_ref[...] = (acc_ref[...] + b_ref[...]).astype(o_ref.dtype)


def linear(x2d, w, b=None, out_dtype=jnp.bfloat16):
    """x2d: (M, K), w: (K, N), b: (N,) or None -> (M, N) in out_dtype.
    Inputs are cast to bf16 outside the kernel (once, in XLA)."""
    M, K = x2d.shape
    N = w.shape[1]
    x2d = x2d.astype(jnp.bfloat16)
    w = w.astype(jnp.bfloat16)
    if b is None:
        b = jnp.zeros((N,), jnp.float32)
    b = b.astype(jnp.float32).reshape(1, N)

    tm = _pick_tile(M, 256, 8)
    tn = _pick_tile(N, 512, 128)
    tk = _pick_tile(K, 512, 128)
    grid = (M // tm, N // tn, K // tk)
    nbytes = (tm * tk + tk * tn) * 2 * 2 + tm * tn * 4 + tm * tn * 4 + tn * 4

    return pl.pallas_call(
        _linear_kernel,
        out_shape=jax.ShapeDtypeStruct((M, N), out_dtype),
        grid=grid,
        in_specs=[pl.BlockSpec((tm, tk), lambda i, j, k: (i, k)),
                  pl.BlockSpec((tk, tn), lambda i, j, k: (k, j)),
                  pl.BlockSpec((1, tn), lambda i, j, k: (0, j))],
        out_specs=pl.BlockSpec((tm, tn), lambda i, j, k: (i, j)),
        scratch_shapes=[pltpu.VMEM((tm, tn), jnp.float32)],
        compiler_params=_cparams(("parallel", "parallel", "arbitrary"), nbytes),
    )(x2d, w, b)


# ---------------------------------------------------------------------------
# Fused attention-output-projection + residual + LayerNorm   (row tiled)
# ---------------------------------------------------------------------------

def _proj_res_ln_kernel(y_ref, w_ref, b_ref, r_ref, g_ref, beta_ref, o_ref, *, eps):
    att = jnp.dot(y_ref[...], w_ref[...],
                  preferred_element_type=jnp.float32) + b_ref[...]
    x = att + r_ref[...].astype(jnp.float32)
    mean = jnp.mean(x, axis=-1, keepdims=True)
    var = jnp.mean(jnp.square(x - mean), axis=-1, keepdims=True)
    o_ref[...] = ((x - mean) * jax.lax.rsqrt(var + eps) * g_ref[...]
                  + beta_ref[...]).astype(o_ref.dtype)


def proj_residual_ln(y2d, w, b, res2d, gamma, beta, eps=1e-5):
    """LayerNorm(y2d @ w + b + res2d) over the last dim. Output bf16."""
    M, E = y2d.shape
    tm = _row_tile(M)
    y2d = y2d.astype(jnp.bfloat16)
    w = w.astype(jnp.bfloat16)
    res2d = res2d.astype(jnp.bfloat16)
    nbytes = E * E * 2 + 2 * (2 * tm * E * 2) + 4 * E * 4 + tm * E * 4

    return pl.pallas_call(
        functools.partial(_proj_res_ln_kernel, eps=eps),
        out_shape=jax.ShapeDtypeStruct((M, E), jnp.bfloat16),
        grid=(M // tm,),
        in_specs=[pl.BlockSpec((tm, E), lambda i: (i, 0)),
                  _const_spec((E, E), lambda i: (0, 0)),
                  _const_spec((1, E), lambda i: (0, 0)),
                  pl.BlockSpec((tm, E), lambda i: (i, 0)),
                  _const_spec((1, E), lambda i: (0, 0)),
                  _const_spec((1, E), lambda i: (0, 0))],
        out_specs=pl.BlockSpec((tm, E), lambda i: (i, 0)),
        compiler_params=_cparams(("parallel",), nbytes),
    )(y2d, w, b.astype(jnp.float32).reshape(1, E), res2d,
      gamma.astype(jnp.float32).reshape(1, E),
      beta.astype(jnp.float32).reshape(1, E))


# ---------------------------------------------------------------------------
# Fused FFN (relu(x@W1+b1)@W2+b2) + residual + LayerNorm
#   grid = (row tiles, H tiles)  -- hidden dim is K-tiled with an f32 acc.
# ---------------------------------------------------------------------------

def _ffn_res_ln_kernel(x_ref, w1_ref, b1_ref, w2_ref, b2_ref, g_ref, beta_ref,
                       o_ref, acc_ref, *, eps):
    j = pl.program_id(1)

    @pl.when(j == 0)
    def _():
        acc_ref[...] = jnp.zeros_like(acc_ref)

    h = jnp.dot(x_ref[...], w1_ref[...],
                preferred_element_type=jnp.float32) + b1_ref[...]
    h = jnp.maximum(h, 0.0).astype(jnp.bfloat16)
    acc_ref[...] += jnp.dot(h, w2_ref[...], preferred_element_type=jnp.float32)

    @pl.when(j == pl.num_programs(1) - 1)
    def _():
        z = acc_ref[...] + b2_ref[...] + x_ref[...].astype(jnp.float32)
        mean = jnp.mean(z, axis=-1, keepdims=True)
        var = jnp.mean(jnp.square(z - mean), axis=-1, keepdims=True)
        o_ref[...] = ((z - mean) * jax.lax.rsqrt(var + eps) * g_ref[...]
                      + beta_ref[...]).astype(o_ref.dtype)


def ffn_residual_ln(x2d, w1, b1, w2, b2, gamma, beta, eps=1e-5):
    M, E = x2d.shape
    H = w1.shape[1]
    tm = _row_tile(M)
    th = _pick_tile(H, 512, 128)
    x2d = x2d.astype(jnp.bfloat16)
    w1 = w1.astype(jnp.bfloat16)
    w2 = w2.astype(jnp.bfloat16)
    nbytes = 2 * (2 * E * th * 2) + 2 * tm * E * 2 + tm * E * 4 + tm * th * 4

    return pl.pallas_call(
        functools.partial(_ffn_res_ln_kernel, eps=eps),
        out_shape=jax.ShapeDtypeStruct((M, E), jnp.bfloat16),
        grid=(M // tm, H // th),
        in_specs=[pl.BlockSpec((tm, E), lambda i, j: (i, 0)),
                  pl.BlockSpec((E, th), lambda i, j: (0, j)),
                  pl.BlockSpec((1, th), lambda i, j: (0, j)),
                  pl.BlockSpec((th, E), lambda i, j: (j, 0)),
                  _const_spec((1, E), lambda i, j: (0, 0)),
                  _const_spec((1, E), lambda i, j: (0, 0)),
                  _const_spec((1, E), lambda i, j: (0, 0))],
        out_specs=pl.BlockSpec((tm, E), lambda i, j: (i, 0)),
        scratch_shapes=[pltpu.VMEM((tm, E), jnp.float32)],
        compiler_params=_cparams(("parallel", "arbitrary"), nbytes),
    )(x2d, w1, b1.astype(jnp.float32).reshape(1, H), w2,
      b2.astype(jnp.float32).reshape(1, E),
      gamma.astype(jnp.float32).reshape(1, E),
      beta.astype(jnp.float32).reshape(1, E))


# ---------------------------------------------------------------------------
# Flash-style attention: grid=(batch, Lq-tiles, Lk-tiles), online softmax,
# heads packed along the lane dim, lane-dense (1, tq, E) output.
# ---------------------------------------------------------------------------

def _flash_attn_kernel(*refs, heads, hd, causal, use_pad):
    if use_pad:
        pad_ref, q_ref, k_ref, v_ref, o_ref, m_ref, l_ref, acc_ref = refs
    else:
        q_ref, k_ref, v_ref, o_ref, m_ref, l_ref, acc_ref = refs

    ki = pl.program_id(2)
    tq = q_ref.shape[1]
    tk = k_ref.shape[1]

    @pl.when(ki == 0)
    def _():
        m_ref[...] = jnp.full_like(m_ref, -jnp.inf)
        l_ref[...] = jnp.zeros_like(l_ref)
        acc_ref[...] = jnp.zeros_like(acc_ref)

    neg = jnp.float32(-1e20)
    if use_pad:
        pad_valid = pad_ref[0] != 0                       # (1, tk) bool
    if causal:
        q0 = pl.program_id(1) * tq
        k0 = ki * tk
        row_ids = q0 + jax.lax.broadcasted_iota(jnp.int32, (tq, tk), 0)
        col_ids = k0 + jax.lax.broadcasted_iota(jnp.int32, (tq, tk), 1)
        causal_ok = col_ids <= row_ids                    # (tq, tk) bool

    for h in range(heads):
        sl = slice(h * hd, (h + 1) * hd)
        q_h = q_ref[0, :, sl]                             # (tq, hd) bf16
        k_h = k_ref[0, :, sl]                             # (tk, hd) bf16
        s = jax.lax.dot_general(q_h, k_h, (((1,), (1,)), ((), ())),
                                preferred_element_type=jnp.float32)  # (tq, tk)
        if use_pad:
            s = jnp.where(pad_valid, s, neg)
        if causal:
            s = jnp.where(causal_ok, s, neg)

        m_prev = m_ref[h]                                 # (tq, 1)
        l_prev = l_ref[h]                                 # (tq, 1)
        m_cur = jnp.max(s, axis=-1, keepdims=True)
        m_new = jnp.maximum(m_prev, m_cur)
        alpha = jnp.exp(m_prev - m_new)                   # (tq, 1)
        p = jnp.exp(s - m_new)                            # (tq, tk)
        l_ref[h] = alpha * l_prev + jnp.sum(p, axis=-1, keepdims=True)
        m_ref[h] = m_new
        pv = jax.lax.dot_general(p.astype(jnp.bfloat16), v_ref[0, :, sl],
                                 (((1,), (0,)), ((), ())),
                                 preferred_element_type=jnp.float32)  # (tq, hd)
        acc_ref[:, sl] = alpha * acc_ref[:, sl] + pv

    @pl.when(ki == pl.num_programs(2) - 1)
    def _():
        for h in range(heads):
            sl = slice(h * hd, (h + 1) * hd)
            acc_ref[:, sl] = acc_ref[:, sl] * pl.reciprocal(l_ref[h], approx=True)
        o_ref[0] = acc_ref[...].astype(o_ref.dtype)       # lane-dense (tq, E)


def flash_attention(q_src, q_col, k_src, k_col, v_src, v_col, pad3, *,
                    E, heads, causal, use_pad):
    """q_src/k_src/v_src: (N, L, W) bf16 with the relevant projection occupying
    columns [col*E, (col+1)*E).  Returns (N, Lq, E) bf16 (heads merged)."""
    N, Lq = q_src.shape[0], q_src.shape[1]
    Lk = k_src.shape[1]
    hd = E // heads
    tq = _pick_tile(Lq, 256, 8)
    tk = _pick_tile(Lk, 256, 128)

    kernel = functools.partial(_flash_attn_kernel, heads=heads, hd=hd,
                               causal=causal, use_pad=use_pad)

    in_specs = []
    operands = []
    if use_pad:
        in_specs.append(pl.BlockSpec((1, 1, tk), lambda b, qi, ki: (b, 0, ki)))
        operands.append(pad3)
    in_specs += [
        pl.BlockSpec((1, tq, E), lambda b, qi, ki, c=q_col: (b, qi, c)),
        pl.BlockSpec((1, tk, E), lambda b, qi, ki, c=k_col: (b, ki, c)),
        pl.BlockSpec((1, tk, E), lambda b, qi, ki, c=v_col: (b, ki, c)),
    ]
    operands += [q_src.astype(jnp.bfloat16), k_src.astype(jnp.bfloat16),
                 v_src.astype(jnp.bfloat16)]

    nbytes = 2 * (tq * E + 2 * tk * E) * 2 + tq * E * 4 + 2 * tq * E * 2

    return pl.pallas_call(
        kernel,
        out_shape=jax.ShapeDtypeStruct((N, Lq, E), jnp.bfloat16),
        grid=(N, Lq // tq, Lk // tk),
        in_specs=in_specs,
        out_specs=pl.BlockSpec((1, tq, E), lambda b, qi, ki: (b, qi, 0)),
        scratch_shapes=[pltpu.VMEM((heads, tq, 1), jnp.float32),
                        pltpu.VMEM((heads, tq, 1), jnp.float32),
                        pltpu.VMEM((tq, E), jnp.float32)],
        compiler_params=_cparams(("parallel", "parallel", "arbitrary"), nbytes),
    )(*operands)


# ---------------------------------------------------------------------------
# Multi-head attention (block-diagonal shared-per-head projections, fused QKV)
# ---------------------------------------------------------------------------

def multihead_attention(p, values, keys, query, pad_mask, embed_size, heads,
                        causal=False, use_pad=True):
    """Returns the concatenated per-head attention output (N*Lq, E) bf16, i.e.
    the tensor *before* fc_out (fc_out is fused into proj_residual_ln)."""
    N, Lq, E = query.shape
    Lk = keys.shape[1]
    scale = 1.0 / math.sqrt(embed_size)

    # Block-diagonal (E, E) weights == per-head (hd, hd) projection, lane-dense.
    eye_h = jnp.eye(heads, dtype=jnp.float32)
    wq_bd = (jnp.kron(eye_h, p["wq"]) * scale).astype(jnp.bfloat16)  # fold scale
    wk_bd = jnp.kron(eye_h, p["wk"]).astype(jnp.bfloat16)
    wv_bd = jnp.kron(eye_h, p["wv"]).astype(jnp.bfloat16)

    packed_ok = (E % 128 == 0)
    q2d = query.reshape(N * Lq, E)

    if (query is keys) and (keys is values):
        # Fused QKV: one matmul, attention reads the packed (N, L, 3E) directly.
        w_all = jnp.concatenate([wq_bd, wk_bd, wv_bd], axis=1)      # (E, 3E)
        qkv3 = linear(q2d, w_all).reshape(N, Lq, 3 * E)
        if packed_ok:
            q_src, qc = qkv3, 0
            k_src, kc = qkv3, 1
            v_src, vc = qkv3, 2
        else:
            q_src, qc = qkv3[..., :E], 0
            k_src, kc = qkv3[..., E:2 * E], 0
            v_src, vc = qkv3[..., 2 * E:], 0
    else:
        q_src, qc = linear(q2d, wq_bd).reshape(N, Lq, E), 0
        k2d = keys.reshape(N * Lk, E)
        if keys is values:
            kv3 = linear(k2d, jnp.concatenate([wk_bd, wv_bd], axis=1)
                         ).reshape(N, Lk, 2 * E)
            if packed_ok:
                k_src, kc = kv3, 0
                v_src, vc = kv3, 1
            else:
                k_src, kc = kv3[..., :E], 0
                v_src, vc = kv3[..., E:], 0
        else:
            k_src, kc = linear(k2d, wk_bd).reshape(N, Lk, E), 0
            v_src, vc = linear(values.reshape(N * Lk, E), wv_bd
                               ).reshape(N, Lk, E), 0

    pad3 = None
    if use_pad:
        pad3 = pad_mask.reshape(N, 1, Lk).astype(jnp.int32)

    out = flash_attention(q_src, qc, k_src, kc, v_src, vc, pad3,
                          E=E, heads=heads, causal=causal, use_pad=use_pad)
    return out.reshape(N * Lq, E)


# ---------------------------------------------------------------------------
# Model blocks
# ---------------------------------------------------------------------------

def transformer_block(p, value, key, query, pad_mask, embed_size, heads,
                      use_pad=True):
    N, Lq, E = query.shape
    att2 = multihead_attention(p["attn"], value, key, query, pad_mask,
                               embed_size, heads, causal=False, use_pad=use_pad)
    x2 = proj_residual_ln(att2, p["attn"]["fc_w"], p["attn"]["fc_b"],
                          query.reshape(N * Lq, E), p["ln1_g"], p["ln1_b"])
    out2 = ffn_residual_ln(x2, p["ff1_w"], p["ff1_b"], p["ff2_w"], p["ff2_b"],
                           p["ln2_g"], p["ln2_b"])
    return out2.reshape(N, Lq, E)


def encoder_forward(p, src, src_pad_mask, embed_size, heads):
    N, L = src.shape
    x = (p["word_emb"][src] + p["pos_emb"][:L][None, :, :]).astype(jnp.bfloat16)
    for lp in p["layers"]:
        x = transformer_block(lp, x, x, x, src_pad_mask, embed_size, heads,
                              use_pad=True)
    return x


def decoder_forward(p, trg, enc_out, src_pad_mask, embed_size, heads):
    N, L = trg.shape
    E = embed_size
    x = (p["word_emb"][trg] + p["pos_emb"][:L][None, :, :]).astype(jnp.bfloat16)
    for lp in p["layers"]:
        # causal-only self-attention (reference trg mask has no padding term)
        att2 = multihead_attention(lp["attn"], x, x, x, None, embed_size, heads,
                                   causal=True, use_pad=False)
        q2 = proj_residual_ln(att2, lp["attn"]["fc_w"], lp["attn"]["fc_b"],
                              x.reshape(N * L, E), lp["ln_g"], lp["ln_b"])
        query = q2.reshape(N, L, E)
        x = transformer_block(lp["tb"], enc_out, enc_out, query, src_pad_mask,
                              embed_size, heads, use_pad=True)
    logits = linear(x.reshape(N * L, E), p["fc_w"], p["fc_b"],
                    out_dtype=jnp.float32)
    return logits.reshape(N, L, -1)


def transformer_forward(params, src, trg, src_pad_idx, embed_size, heads):
    src_pad_mask = (src != src_pad_idx).astype(jnp.int32)      # (N, Ls)
    enc_src = encoder_forward(params["encoder"], src, src_pad_mask,
                              embed_size, heads)
    return decoder_forward(params["decoder"], trg, enc_src, src_pad_mask,
                           embed_size, heads)
# TODO(synk): dropout > 0 (training mode) is not implemented; module default is 0.


# ---------------------------------------------------------------------------
# Pure-JAX f32 reference of the same module (numerical sanity check)
# ---------------------------------------------------------------------------

def _ref_attention(p, values, keys, query, mask, embed_size, heads):
    N, Lq, E = query.shape
    Lk = keys.shape[1]
    hd = E // heads
    q = query.reshape(N, Lq, heads, hd) @ p["wq"]
    k = keys.reshape(N, Lk, heads, hd) @ p["wk"]
    v = values.reshape(N, Lk, heads, hd) @ p["wv"]
    energy = jnp.einsum("nqhd,nkhd->nhqk", q, k)
    energy = jnp.where(mask == 0, jnp.float32(-1e20), energy)
    att = jax.nn.softmax(energy / math.sqrt(embed_size), axis=3)
    out = jnp.einsum("nhqk,nkhd->nqhd", att, v).reshape(N, Lq, E)
    return out @ p["fc_w"] + p["fc_b"]


def _ref_ln(x, g, b, eps=1e-5):
    m = x.mean(-1, keepdims=True)
    v = ((x - m) ** 2).mean(-1, keepdims=True)
    return (x - m) * jax.lax.rsqrt(v + eps) * g + b


def _ref_block(p, value, key, query, mask, embed_size, heads):
    a = _ref_attention(p["attn"], value, key, query, mask, embed_size, heads)
    x = _ref_ln(a + query, p["ln1_g"], p["ln1_b"])
    h = jnp.maximum(x @ p["ff1_w"] + p["ff1_b"], 0.0)
    f = h @ p["ff2_w"] + p["ff2_b"]
    return _ref_ln(f + x, p["ln2_g"], p["ln2_b"])


def _ref_forward(params, src, trg, src_pad_idx, embed_size, heads):
    N, Ls = src.shape
    _, Lt = trg.shape
    src_mask = (src != src_pad_idx)[:, None, None, :]
    trg_mask = jnp.broadcast_to(jnp.tril(jnp.ones((Lt, Lt), jnp.float32)),
                                (N, 1, Lt, Lt))
    pe, pd = params["encoder"], params["decoder"]
    out = pe["word_emb"][src] + pe["pos_emb"][:Ls][None]
    for lp in pe["layers"]:
        out = _ref_block(lp, out, out, out, src_mask, embed_size, heads)
    x = pd["word_emb"][trg] + pd["pos_emb"][:Lt][None]
    for lp in pd["layers"]:
        a = _ref_attention(lp["attn"], x, x, x, trg_mask, embed_size, heads)
        q = _ref_ln(a + x, lp["ln_g"], lp["ln_b"])
        x = _ref_block(lp["tb"], out, out, q, src_mask, embed_size, heads)
    return x @ pd["fc_w"] + pd["fc_b"]


# ---------------------------------------------------------------------------
# Deterministic parameter initialization (synthetic weights, not a checkpoint)
# ---------------------------------------------------------------------------

def _lin_init(key, fan_in, fan_out, scale=0.05):
    kw, kb = jax.random.split(key)
    w = jax.random.normal(kw, (fan_in, fan_out), jnp.float32) * scale
    b = jax.random.normal(kb, (fan_out,), jnp.float32) * scale
    return w, b


def _attn_init(key, embed_size, heads):
    hd = embed_size // heads
    k1, k2, k3, k4 = jax.random.split(key, 4)
    fc_w, fc_b = _lin_init(k4, embed_size, embed_size)
    return dict(
        wq=jax.random.normal(k1, (hd, hd), jnp.float32) * 0.05,
        wk=jax.random.normal(k2, (hd, hd), jnp.float32) * 0.05,
        wv=jax.random.normal(k3, (hd, hd), jnp.float32) * 0.05,
        fc_w=fc_w, fc_b=fc_b,
    )


def _tblock_init(key, embed_size, heads, fe):
    k1, k2, k3 = jax.random.split(key, 3)
    ff1_w, ff1_b = _lin_init(k2, embed_size, fe * embed_size)
    ff2_w, ff2_b = _lin_init(k3, fe * embed_size, embed_size)
    return dict(
        attn=_attn_init(k1, embed_size, heads),
        ln1_g=jnp.ones((embed_size,), jnp.float32),
        ln1_b=jnp.zeros((embed_size,), jnp.float32),
        ln2_g=jnp.ones((embed_size,), jnp.float32),
        ln2_b=jnp.zeros((embed_size,), jnp.float32),
        ff1_w=ff1_w, ff1_b=ff1_b, ff2_w=ff2_w, ff2_b=ff2_b,
    )


def init_params(key, src_vocab, trg_vocab, embed_size, num_layers, heads, fe,
                max_len):
    keys = jax.random.split(key, 5 + 2 * num_layers)
    k_we_s, k_pe_s, k_we_t, k_pe_t, k_fc = keys[:5]
    enc_keys = keys[5:5 + num_layers]
    dec_keys = keys[5 + num_layers:5 + 2 * num_layers]

    enc_layers = [_tblock_init(enc_keys[i], embed_size, heads, fe)
                  for i in range(num_layers)]
    dec_layers = []
    for i in range(num_layers):
        ka, kb = jax.random.split(dec_keys[i])
        dec_layers.append(dict(
            attn=_attn_init(ka, embed_size, heads),
            ln_g=jnp.ones((embed_size,), jnp.float32),
            ln_b=jnp.zeros((embed_size,), jnp.float32),
            tb=_tblock_init(kb, embed_size, heads, fe),
        ))
    fc_w, fc_b = _lin_init(k_fc, embed_size, trg_vocab)
    return dict(
        encoder=dict(
            word_emb=jax.random.normal(k_we_s, (src_vocab, embed_size),
                                       jnp.float32) * 0.05,
            pos_emb=jax.random.normal(k_pe_s, (max_len, embed_size),
                                      jnp.float32) * 0.05,
            layers=enc_layers,
        ),
        decoder=dict(
            word_emb=jax.random.normal(k_we_t, (trg_vocab, embed_size),
                                       jnp.float32) * 0.05,
            pos_emb=jax.random.normal(k_pe_t, (max_len, embed_size),
                                      jnp.float32) * 0.05,
            layers=dec_layers,
            fc_w=fc_w, fc_b=fc_b,
        ),
    )


# ---------------------------------------------------------------------------

if __name__ == "__main__":
    SRC_VOCAB, TRG_VOCAB = 11, 13
    SRC_PAD = 0
    EMBED, LAYERS, HEADS, FE, MAXLEN = 128, 2, 4, 4, 16
    N, LS, LT = 2, 8, 8

    key = jax.random.PRNGKey(0)
    kp, ks, kt = jax.random.split(key, 3)
    params = init_params(kp, SRC_VOCAB, TRG_VOCAB, EMBED, LAYERS, HEADS, FE,
                         MAXLEN)

    src = jax.random.randint(ks, (N, LS), 0, SRC_VOCAB, dtype=jnp.int32)
    trg = jax.random.randint(kt, (N, LT), 0, TRG_VOCAB, dtype=jnp.int32)

    out = transformer_forward(params, src, trg, SRC_PAD, EMBED, HEADS)
    out = jax.block_until_ready(out)

    assert out.shape == (N, LT, TRG_VOCAB), out.shape
    assert bool(jnp.all(jnp.isfinite(out)))

    # Loose sanity check vs. a pure-JAX f32 reference (bf16 kernel boundaries
    # and the approximate softmax reciprocal introduce small, bounded error).
    ref = _ref_forward(params, src, trg, SRC_PAD, EMBED, HEADS)
    max_err = float(jnp.max(jnp.abs(out - ref)))
    assert max_err < 0.15, f"max abs err vs reference: {max_err}"

    print("KERNEL_OK")
</pallas_src>

<mosaic_0001>
module attributes {stable_mosaic.version = 11 : i64} {
  func.func @_linear_kernel(%arg0: i32, %arg1: i32, %arg2: i32, %arg3: memref<16x128xbf16, #tpu.memory_space<vmem>>, %arg4: memref<128x384xbf16, #tpu.memory_space<vmem>>, %arg5: memref<1x384xf32, #tpu.memory_space<vmem>>, %arg6: memref<16x384xbf16, #tpu.memory_space<vmem>>, %arg7: memref<16x384xf32, #tpu.memory_space<vmem>>) attributes {dimension_semantics = [#tpu.dimension_semantics<parallel>, #tpu.dimension_semantics<parallel>, #tpu.dimension_semantics<arbitrary>], iteration_bounds = array<i64: 1, 1, 1>, scalar_prefetch = 0 : i64, scratch_operands = 1 : i64, tpu.core_type = #tpu.core_type<tc>, window_params = [{transform_indices = @transform_0, window_bounds = array<i64: 16, 128>}, {transform_indices = @transform_1, window_bounds = array<i64: 128, 384>}, {transform_indices = @transform_2, window_bounds = array<i64: 1, 384>}, {transform_indices = @transform_3, window_bounds = array<i64: 16, 384>}]} {
    %c0_i32 = arith.constant 0 : i32
    %0 = arith.cmpi eq, %arg2, %c0_i32 : i32
    %1 = arith.extui %0 : i1 to i32
    %c0_i32_0 = arith.constant 0 : i32
    %2 = arith.cmpi ne, %1, %c0_i32_0 : i32
    scf.if %2 {
      %cst_10 = arith.constant 0.000000e+00 : f32
      %12 = vector.broadcast %cst_10 : f32 to vector<16x384xf32>
      %c0_11 = arith.constant 0 : index
      %c0_12 = arith.constant 0 : index
      %13 = vector.load %arg7[%c0_11, %c0_12] : memref<16x384xf32, #tpu.memory_space<vmem>>, vector<16x384xf32>
      tpu.vector_store %arg7[%c0_11, %c0_12], %12 {strides = array<i32>} : memref<16x384xf32, #tpu.memory_space<vmem>>, vector<16x384xf32>,
    } else {
    }
    %c0 = arith.constant 0 : index
    %c0_1 = arith.constant 0 : index
    %3 = vector.load %arg7[%c0, %c0_1] : memref<16x384xf32, #tpu.memory_space<vmem>>, vector<16x384xf32>
    %c0_2 = arith.constant 0 : index
    %c0_3 = arith.constant 0 : index
    %4 = vector.load %arg3[%c0_2, %c0_3] : memref<16x128xbf16, #tpu.memory_space<vmem>>, vector<16x128xbf16>
    %c0_4 = arith.constant 0 : index
    %c0_5 = arith.constant 0 : index
    %5 = vector.load %arg4[%c0_4, %c0_5] : memref<128x384xbf16, #tpu.memory_space<vmem>>, vector<128x384xbf16>
    %cst = arith.constant dense<0.000000e+00> : vector<16x384xf32>
    %6 = tpu.matmul %4, %5, %cst {dimension_numbers = #tpu.dot_dimension_numbers<[1], [0], [0], [1], [0, 0, 1, 1], [], []>} : vector<16x128xbf16>, vector<128x384xbf16>, vector<16x384xf32> -> vector<16x384xf32>
    %7 = arith.addf %3, %6 : vector<16x384xf32>
    %c0_6 = arith.constant 0 : index
    %c0_7 = arith.constant 0 : index
    %8 = vector.load %arg7[%c0_6, %c0_7] : memref<16x384xf32, #tpu.memory_space<vmem>>, vector<16x384xf32>
    tpu.vector_store %arg7[%c0_6, %c0_7], %7 {strides = array<i32>} : memref<16x384xf32, #tpu.memory_space<vmem>>, vector<16x384xf32>,
    %c0_i32_8 = arith.constant 0 : i32
    %9 = arith.cmpi eq, %arg2, %c0_i32_8 : i32
    %10 = arith.extui %9 : i1 to i32
    %c0_i32_9 = arith.constant 0 : i32
    %11 = arith.cmpi ne, %10, %c0_i32_9 : i32
    scf.if %11 {
      %c0_10 = arith.constant 0 : index
      %c0_11 = arith.constant 0 : index
      %12 = vector.load %arg7[%c0_10, %c0_11] : memref<16x384xf32, #tpu.memory_space<vmem>>, vector<16x384xf32>
      %c0_12 = arith.constant 0 : index
      %c0_13 = arith.constant 0 : index
      %13 = vector.load %arg5[%c0_12, %c0_13] : memref<1x384xf32, #tpu.memory_space<vmem>>, vector<1x384xf32>
      %14 = vector.broadcast %13 : vector<1x384xf32> to vector<16x384xf32>
      %15 = arith.addf %12, %14 : vector<16x384xf32>
      %16 = arith.truncf %15 : vector<16x384xf32> to vector<16x384xbf16>
      %c0_14 = arith.constant 0 : index
      %c0_15 = arith.constant 0 : index
      %17 = vector.load %arg6[%c0_14, %c0_15] : memref<16x384xbf16, #tpu.memory_space<vmem>>, vector<16x384xbf16>
      tpu.vector_store %arg6[%c0_14, %c0_15], %16 {strides = array<i32>} : memref<16x384xbf16, #tpu.memory_space<vmem>>, vector<16x384xbf16>,
    } else {
    }
    return
  }
  func.func @transform_0(%arg0: i32, %arg1: i32, %arg2: i32) -> (i32, i32) {
    %c0_i32 = arith.constant 0 : i32
    return %arg0, %arg2 : i32, i32
  }
  func.func @transform_1(%arg0: i32, %arg1: i32, %arg2: i32) -> (i32, i32) {
    %c0_i32 = arith.constant 0 : i32
    return %arg2, %arg1 : i32, i32
  }
  func.func @transform_2(%arg0: i32, %arg1: i32, %arg2: i32) -> (i32, i32) {
    %c0_i32 = arith.constant 0 : i32
    %c0_i32_0 = arith.constant 0 : i32
    return %c0_i32, %arg1 : i32, i32
  }
  func.func @transform_3(%arg0: i32, %arg1: i32, %arg2: i32) -> (i32, i32) {
    %c0_i32 = arith.constant 0 : i32
    return %arg0, %arg1 : i32, i32
  }
}

</mosaic_0001>

<bundles_post_ra>
// kernel: tpu_custom_call.1
= control target key start
LH: loop header
LB: loop body
LE: loop exit
PB: predicated region body
PF: predicated region fallthrough
CT: control target
= control target key end

     0   :  { %8 = vsyncpa [#allocation4], 0  ;;  %s650_s0 = inlined_call_operand.hbm [shape: bf16[16,128], index: 0, kind: input, shape index: {}]   ;;  %s651_s1 = inlined_call_operand.hbm [shape: bf16[128,384], index: 1, kind: input, shape index: {}]   ;;  %s652_s2 = inlined_call_operand.vmem [shape: f32[1,384], index: 2, kind: input, shape index: {}]   ;;  %s653_s3 = inlined_call_operand.hbm [shape: bf16[16,384], index: 3, kind: output, shape index: {}]  }
   0x1   :  { %9 = vsyncpa [#allocation7], 0 }
   0x2   :  { %10 = vsyncpa [#allocation5], 0  ;;  %s575_s12 = smov [#allocation3]   ;;  %s503_s16 = scalar_lea.hbm %s650_s0, 128 }
   0x3   :  { %s16_s13 = sshll.u32 %s575_s12, 4  ;;  %p504_p0 = scmp.ne.s32.totalorder %s650_s0, %s503_s16  ;;  %s17_s13 = int_to_ptr.vmem [resolvable:$true] %s16_s13 }
   0x4   :  { %p507_p1 = scmp.lt.u32.totalorder %s503_s16, %s650_s0 }
   0x6   :  { %p509_p2 = pnand %p507_p1, %p504_p0 }
   0x8   :  { %512 = shalt.err (!%p509_p2)
}
   0x9   :  { %s513_s21 = scalar_lea.vmem %s17_s13, 128  ;;  %p518_p4 = scmp.lt.s32.totalorder %s17_s13, %s17_s13 }
   0xa   :  { %p514_p3 = scmp.ne.s32.totalorder %s17_s13, %s513_s21  ;;  %p519_p5 = scmp.lt.s32.totalorder %s513_s21, %s513_s21 }
   0xc   :  { %p520_p6 = por %p519_p5, %p518_p4 }
   0xe   :  { %p521_p7 = pnand %p520_p6, %p514_p3 }
  0x10   :  { %524 = shalt.err (!%p521_p7)
}
  0x11   :  { %s576_s22 = smov 64   ;;  %s577_s23 = smov 4  }
  0x12   :  { %22 = dma.hbm_to_vmem [thread:$0]  %s650_s0, 128, %s17_s13, [#allocation4], %s576_s22, %s576_s22, %s577_s23  }
  0x13   :  { %s578_s26 = smov [#allocation6]   ;;  %s525_s30 = scalar_lea.hbm %s651_s1, 3072 }
  0x14   :  { %s28_s27 = sshll.u32 %s578_s26, 4  ;;  %p526_p8 = scmp.ne.s32.totalorder %s651_s1, %s525_s30  ;;  %s29_s27 = int_to_ptr.vmem [resolvable:$true] %s28_s27 }
  0x15   :  { %p529_p9 = scmp.lt.u32.totalorder %s525_s30, %s651_s1 }
  0x17   :  { %p531_p10 = pnand %p529_p9, %p526_p8 }
  0x19   :  { %534 = shalt.err (!%p531_p10)
}
  0x1a   :  { %s535_s8 = scalar_lea.vmem %s29_s27, 3072  ;;  %p540_p12 = scmp.lt.s32.totalorder %s29_s27, %s29_s27 }
  0x1b   :  { %p536_p11 = scmp.ne.s32.totalorder %s29_s27, %s535_s8  ;;  %p541_p13 = scmp.lt.s32.totalorder %s535_s8, %s535_s8 }
  0x1d   :  { %p542_p0 = por %p541_p13, %p540_p12 }
  0x1f   :  { %p543_p1 = pnand %p542_p0, %p536_p11 }
  0x21   :  { %546 = shalt.err (!%p543_p1)
}
  0x22   :  { %s579_s0 = smov 192   ;;  %s580_s9 = smov 12  }
  0x23   :  { %34 = dma.hbm_to_vmem [thread:$0]  %s651_s1, 3072, %s29_s27, [#allocation7], %s579_s0, %s579_s0, %s580_s9  }
  0x24   :  { %569 = dma.done.wait [#allocation4], 128  }
  0x25   :  { %570 = vsyncadd [#allocation4], 4294967168 }
  0x26   :  { %571 = dma.done.wait [#allocation7], 3072  }
  0x27   :  { %572 = vsyncadd [#allocation7], 4294964224  ;;  %v581_v0 = vmov 0.0   ;;  %vm582_vm0 = vmmov 0   ;;  %v583_v1 = vmov 0   ;;  %v502_v26 = vld [vmem:[#allocation3] sm:$0xff]   ;;  %v335_v27 = vlaneseq }
  0x28   :  { %440 = vmatprep.subr.bf16.mxu1 %v581_v0  ;;  %456 = vmatprep.mubr.msk.bf16.mxu1 %vm582_vm0, %v581_v0  ;;  %v470_v2 = vld [vmem:[#allocation6 + $0x4] ss:$12 sps:$4 sm:$0xff]   ;;  %v472_v3 = vld [vmem:[#allocation6 + $0x8] ss:$12 sps:$4 sm:$0xff]   ;;  %v473_v4 = vld [vmem:[#allocation6] ss:$12 sps:$4 sm:$0xff]  }
  0x29   :  { %260 = vmatprep.mubr.bf16.mxu0 %v583_v1  ;;  %228 = vmatprep.subr.bf16.mxu0 %v470_v2  ;;  %v474_v5 = vld [vmem:[#allocation6 + $0x1c] ss:$12 sps:$4 sm:$0xff]   ;;  %v476_v6 = vld [vmem:[#allocation6 + $0x20] ss:$12 sps:$4 sm:$0xff]   ;;  %v477_v7 = vld [vmem:[#allocation6 + $0x18] ss:$12 sps:$4 sm:$0xff]  }
  0x2a   :  { %441 = vmatpush3.bf16.msra.mxu1 %v472_v3  ;;  %229 = vmatpush1.bf16.msra.mxu0 %v473_v4  ;;  %v478_v8 = vld [vmem:[#allocation6 + $0x34] ss:$12 sps:$4 sm:$0xff]   ;;  %v480_v9 = vld [vmem:[#allocation6 + $0x38] ss:$12 sps:$4 sm:$0xff]   ;;  %v481_v10 = vld [vmem:[#allocation6 + $0x30] ss:$12 sps:$4 sm:$0xff]  }
  0x2b   :  { %442 = vmatprep.subr.bf16.mxu1 %v581_v0  ;;  %230 = vmatprep.subr.bf16.mxu0 %v474_v5  ;;  %v482_v11 = vld [vmem:[#allocation6 + $0x4c] ss:$12 sps:$4 sm:$0xff]   ;;  %v484_v12 = vld [vmem:[#allocation6 + $0x50] ss:$12 sps:$4 sm:$0xff]   ;;  %v485_v13 = vld [vmem:[#allocation6 + $0x48] ss:$12 sps:$4 sm:$0xff]  }
  0x2c   :  { %v486_v14 = vld [vmem:[#allocation6 + $0x64] ss:$12 sps:$4 sm:$0xff]   ;;  %v488_v15 = vld [vmem:[#allocation6 + $0x68] ss:$12 sps:$4 sm:$0xff]   ;;  %v489_v16 = vld [vmem:[#allocation6 + $0x60] ss:$12 sps:$4 sm:$0xff]  }
  0x2d   :  { %v490_v17 = vld [vmem:[#allocation6 + $0x7c] ss:$12 sps:$4 sm:$0xff]   ;;  %v492_v18 = vld [vmem:[#allocation6 + $0x80] ss:$12 sps:$4 sm:$0xff]   ;;  %v493_v19 = vld [vmem:[#allocation6 + $0x78] ss:$12 sps:$4 sm:$0xff]  }
  0x2e   :  { %443 = vmatpush3.bf16.msra.mxu1 %v476_v6  ;;  %231 = vmatpush1.bf16.msra.mxu0 %v477_v7  ;;  %v494_v20 = vld [vmem:[#allocation6 + $0x94] ss:$12 sps:$4 sm:$0xff]   ;;  %v496_v21 = vld [vmem:[#allocation6 + $0x98] ss:$12 sps:$4 sm:$0xff]   ;;  %v497_v22 = vld [vmem:[#allocation6 + $0x90] ss:$12 sps:$4 sm:$0xff]  }
  0x2f   :  { %444 = vmatprep.subr.bf16.mxu1 %v581_v0  ;;  %232 = vmatprep.subr.bf16.mxu0 %v478_v8  ;;  %v498_v23 = vld [vmem:[#allocation6 + $0xac] ss:$12 sps:$4 sm:$0xff]   ;;  %v500_v24 = vld [vmem:[#allocation6 + $0xb0] ss:$12 sps:$4 sm:$0xff]   ;;  %v501_v25 = vld [vmem:[#allocation6 + $0xa8] ss:$12 sps:$4 sm:$0xff]  }
  0x30   :  { %v336_v28 = vshrl.u32 %v335_v27, 7  ;;  %v333_v30 = vld [vmem:[%s652_s2] sm:$0x7]  ;;  %s584_s2 = smov [#allocation8]  }
  0x31   :  { %s385_s13 = sshll.u32 %s584_s2, 4  ;;  %s386_s13 = int_to_ptr.vmem [resolvable:$true] %s385_s13 }
  0x32   :  { %445 = vmatpush3.bf16.msra.mxu1 %v480_v9  ;;  %233 = vmatpush1.bf16.msra.mxu0 %v481_v10  ;;  %v345_v29 = vsub.s32 2, %v336_v28  ;;  %v337_v31 = vsub.s32 0, %v336_v28  ;;  %v341_v32 = vsub.s32 1, %v336_v28  ;;  %s547_s14 = scalar_lea.vmem %s386_s13, 384  ;;  %p552_p3 = scmp.lt.s32.totalorder %s386_s13, %s386_s13 }
  0x33   :  { %446 = vmatprep.subr.bf16.mxu1 %v581_v0  ;;  %234 = vmatprep.subr.bf16.mxu0 %v482_v11  ;;  %p548_p2 = scmp.ne.s32.totalorder %s386_s13, %s547_s14  ;;  %p553_p4 = scmp.lt.s32.totalorder %s547_s14, %s547_s14 }
  0x34   :  { %v346_v33 = vrot.slane %v333_v30, %v345_v29  ;;  %v338_v34 = vrot.slane %v333_v30, %v337_v31  ;;  %v342_v35 = vrot.slane %v333_v30, %v341_v32 }
  0x35   :  { %p554_p5 = por %p553_p4, %p552_p3 }
  0x36   :  { %447 = vmatpush3.bf16.msra.mxu1 %v484_v12  ;;  %235 = vmatpush1.bf16.msra.mxu0 %v485_v13 }
  0x37   :  { %448 = vmatprep.subr.bf16.mxu1 %v581_v0  ;;  %236 = vmatprep.subr.bf16.mxu0 %v486_v14  ;;  %p555_p6 = pnand %p554_p5, %p548_p2 }
  0x3a   :  { %449 = vmatpush3.bf16.msra.mxu1 %v488_v15  ;;  %237 = vmatpush1.bf16.msra.mxu0 %v489_v16 }
  0x3b   :  { %450 = vmatprep.subr.bf16.mxu1 %v581_v0  ;;  %238 = vmatprep.subr.bf16.mxu0 %v490_v17 }
  0x3e   :  { %451 = vmatpush3.bf16.msra.mxu1 %v492_v18  ;;  %239 = vmatpush1.bf16.msra.mxu0 %v493_v19 }
  0x3f   :  { %452 = vmatprep.subr.bf16.mxu1 %v581_v0  ;;  %240 = vmatprep.subr.bf16.mxu0 %v494_v20 }
  0x42   :  { %453 = vmatpush3.bf16.msra.mxu1 %v496_v21  ;;  %241 = vmatpush1.bf16.msra.mxu0 %v497_v22 }
  0x43   :  { %454 = vmatprep.subr.bf16.mxu1 %v581_v0  ;;  %242 = vmatprep.subr.bf16.mxu0 %v498_v23 }
  0x46   :  { %455 = vmatpush3.bf16.msra.mxu1 %v500_v24  ;;  %243 = vmatpush1.bf16.msra.mxu0 %v501_v25 }
  0x49   :  { %457 = vmatmul.mubr.bf16.vlgmr.msra.gmra.mrb[0].mxu1 %v502_v26  ;;  %261 = vmatmul.mubr.bf16.vlgmr.msra.gmra.mrb[0].mxu0 %v502_v26 }
 0x11c   :  { %v305_v36 = vpop.f32.mrb[0].mxu1  ;;  %v262_v38 = vpop.f32.mrb[0].mxu0 }
 0x11d   :  { %v352_v37 = vadd.f32 %v346_v33, %v305_v36  ;;  %v458_v39 = vpop.f32.mrb[1].mxu1  ;;  %v350_v40 = vadd.f32 %v338_v34, %v262_v38  ;;  %v264_v41 = vpop.f32.mrb[1].mxu0 }
 0x11e   :  { %v308_v42 = vpop.f32.mrb[2].mxu1  ;;  %v351_v44 = vadd.f32 %v342_v35, %v264_v41  ;;  %v266_v46 = vpop.f32.mrb[2].mxu0 }
 0x11f   :  { %v428_v43 = vpack.c.bf16 %v352_v37, %v352_v37  ;;  %v355_v45 = vadd.f32 %v346_v33, %v308_v42  ;;  %v459_v47 = vpop.f32.mrb[3].mxu1  ;;  %v353_v48 = vadd.f32 %v338_v34, %v266_v46  ;;  %v268_v49 = vpop.f32.mrb[3].mxu0 }
 0x120   :  { %v427_v50 = vpack.c.bf16 %v351_v44, %v350_v40  ;;  %v354_v52 = vadd.f32 %v342_v35, %v268_v49 }
 0x121   :  { %377 = vst [vmem:[#allocation8 + $0x8] sm:$0xf] %v428_v43  ;;  %v430_v51 = vpack.c.bf16 %v355_v45, %v355_v45 }
 0x122   :  { %376 = vst [vmem:[#allocation8] sm:$0xff] %v427_v50  ;;  %v429_v53 = vpack.c.bf16 %v354_v52, %v353_v48 }
 0x123   :  { %379 = vst [vmem:[#allocation8 + $0x14] sm:$0xf] %v430_v51 }
 0x124   :  { %378 = vst [vmem:[#allocation8 + $0xc] sm:$0xff] %v429_v53 }
 0x125   :  { %558 = shalt.err (!%p555_p6)
}
 0x126   :  { %s559_s17 = scalar_lea.hbm %s653_s3, 384 }
 0x127   :  { %p560_p7 = scmp.ne.s32.totalorder %s653_s3, %s559_s17  ;;  %p563_p8 = scmp.lt.u32.totalorder %s559_s17, %s653_s3 }
 0x129   :  { %p565_p9 = pnand %p563_p8, %p560_p7 }
 0x12b   :  { %568 = shalt.err (!%p565_p9)
}
 0x12c   :  { %391 = dma.vmem_to_hbm [thread:$0]  %s386_s13, 384, %s653_s3, [#allocation5], %s579_s0, %s579_s0, %s580_s9  }
 0x12d   :  { %573 = dma.done.wait [#allocation5], 384  }
 0x12e   :  { %574 = vsyncadd [#allocation5], 4294966912 }
 0x12f   :  { %395 = vsyncpa [#allocation4], 1 }
 0x130   :  { %396 = vsyncpa [#allocation7], 1 }
 0x131   :  { %397 = vsyncpa [#allocation5], 1 }

</bundles_post_ra>
